<compile_context>
chip_gen: v5e
topology: v5e:2x2
jax: 0.10.0
libtpu: 0.0.40
codegen_flags: <defaults>
</compile_context>

<pallas_src>
import jax
import jax.numpy as jnp
from jax import lax
from jax.experimental import pallas as pl
from jax.experimental.pallas import tpu as pltpu


# --------------------------------------------------------------------------- #
# Small helpers
# --------------------------------------------------------------------------- #
def _round_up(x, m):
    return ((x + m - 1) // m) * m


def _device_kind():
    try:
        return jax.devices()[0].device_kind.lower()
    except Exception:
        return ""


def _tensorcores_per_chip():
    # v7x parts have 2 TensorCores per chip; v5e / v6e have 1.
    return 2 if "v7" in _device_kind() else 1


def _default_scoped_vmem_bytes():
    kind = _device_kind()
    if "v5e" in kind or "v5 lite" in kind or "v5lite" in kind:
        return 16 << 20            # v5e default scoped VMEM
    return 32 << 20                # v6e / v7x default scoped VMEM


# --------------------------------------------------------------------------- #
# Kernel body
# --------------------------------------------------------------------------- #
def _attention_body(x_ref, m_ref, w_ref, b_ref, out_ref, *,
                    n_node, hidden, hidden_pad, binary_mask):
    """x_ref: (bt*N, Din), w_ref: (Din, 3*Hp) packed [V|Q|K] (lane-padded),
    b_ref: (1, 3*Hp) f32, m_ref: (bt, N, N) any dtype or None, out_ref: (bt, N, H)."""
    rows, _ = x_ref.shape
    bt = rows // n_node
    Hp = hidden_pad
    cdt = x_ref.dtype                     # MXU input dtype (f32 or bf16)

    # Fused QKV projection: one MXU pass.  Slices below start at multiples of
    # 128 lanes (Hp % 128 == 0), so they are free whole-lane-tile views.
    proj = jnp.dot(x_ref[...], w_ref[...], preferred_element_type=jnp.float32)
    proj = jnp.maximum(proj + b_ref[...], 0.0)                 # (rows, 3*Hp) f32

    # Splitting the leading (sublane) dim into (bt, N) is layout-preserving
    # when N % 8 == 0 (true for the shipped sizes).
    v = proj[:, 0 * Hp:1 * Hp].reshape(bt, n_node, Hp)
    q = proj[:, 1 * Hp:2 * Hp].reshape(bt, n_node, Hp)
    k = proj[:, 2 * Hp:3 * Hp].reshape(bt, n_node, Hp)

    # scores[b,i,j] = sum_h q[b,i,h] * k[b,j,h]; padded h-columns are zero.
    scores = lax.dot_general(
        q.astype(cdt), k.astype(cdt),
        dimension_numbers=(((2,), (2,)), ((0,), (0,))),
        preferred_element_type=jnp.float32)                    # (bt, N, N)

    if m_ref is None:
        h = jnp.clip(scores, 0.0, 9.0e13)
    elif binary_mask:
        # Binary {0,1} mask: select, never widening the N^2 mask to f32.
        h = jnp.where(m_ref[...] != 0, jnp.clip(scores, 0.0, 9.0e13), -9.0e15)
    else:
        # General mask: original clamp(s*m,0,9e13) - 9e15*(1-m), folded.
        m = m_ref[...].astype(jnp.float32)
        h = jnp.clip(scores * m, 0.0, 9.0e13) + 9.0e15 * (m - 1.0)

    # Softmax numerator; normalization happens AFTER the PV matmul (linear),
    # so only bt*N*Hp elements get scaled instead of bt*N*N.
    h_max = jnp.max(h, axis=-1, keepdims=True)
    e = jnp.exp(h - h_max)
    denom = jnp.sum(e, axis=-1, keepdims=True)                 # (bt, N, 1)

    out = lax.dot_general(
        e.astype(cdt), v.astype(cdt),
        dimension_numbers=(((2,), (1,)), ((0,), (0,))),
        preferred_element_type=jnp.float32)                    # (bt, N, Hp)
    out = out * pl.reciprocal(denom, approx=False)             # exact divide, tiny operand

    # Padded columns of `out` are exactly zero; store only the first H lanes.
    # (H < 128 -> lane-masked stores; second-order vs the N^2 mask stream.)
    out_ref[...] = out[..., :hidden].astype(out_ref.dtype)


def _make_kernel(n_node, hidden, hidden_pad, has_mask, binary_mask):
    if has_mask:
        def kernel(x_ref, m_ref, w_ref, b_ref, out_ref):
            _attention_body(x_ref, m_ref, w_ref, b_ref, out_ref,
                            n_node=n_node, hidden=hidden,
                            hidden_pad=hidden_pad, binary_mask=binary_mask)
    else:
        def kernel(x_ref, w_ref, b_ref, out_ref):
            _attention_body(x_ref, None, w_ref, b_ref, out_ref,
                            n_node=n_node, hidden=hidden,
                            hidden_pad=hidden_pad, binary_mask=False)
    return kernel


# --------------------------------------------------------------------------- #
# Parameter packing (do once at init, not per forward call)
# --------------------------------------------------------------------------- #
def pack_params(params, *, compute_dtype=None):
    """Pack [V|Q|K] into one (Din, 3*Hp) weight, each H-wide segment zero-padded
    to a 128-lane boundary so in-kernel slices of the fused projection are
    whole-lane-tile views.  Padded columns give relu(0*x+0)=0, math unchanged."""
    din, hidden = params["wv"].shape
    hp = _round_up(hidden, 128)
    wdt = compute_dtype if compute_dtype is not None else params["wv"].dtype

    def pad_w(w):
        return jnp.pad(w, ((0, 0), (0, hp - hidden)))

    def pad_b(b):
        return jnp.pad(b, (0, hp - hidden))

    w_qkv = jnp.concatenate(
        [pad_w(params["wv"]), pad_w(params["wq"]), pad_w(params["wk"])],
        axis=1).astype(wdt)                                     # (Din, 3*Hp)
    b_qkv = jnp.concatenate(
        [pad_b(params["bv"]), pad_b(params["bq"]), pad_b(params["bk"])]
    ).reshape(1, 3 * hp).astype(jnp.float32)                    # (1, 3*Hp)
    return {"w_qkv": w_qkv, "b_qkv": b_qkv, "hidden": hidden, "hidden_pad": hp}


# --------------------------------------------------------------------------- #
# Block chooser (VMEM- and generation-aware)
# --------------------------------------------------------------------------- #
def _choose_block_b(B, N, Din, hidden, hidden_pad,
                    x_bytes, mask_bytes, out_bytes,
                    vmem_budget_bytes, n_cores):
    Hp = hidden_pad

    def step_bytes(bt):
        rows = bt * N
        db = 2                                     # BlockSpec double-buffering
        vmem = rows * Din * x_bytes * db                      # x block
        vmem += Din * 3 * Hp * x_bytes * db + 3 * Hp * 4 * db  # weights + bias
        vmem += bt * N * hidden * out_bytes * db              # output block
        if mask_bytes:
            vmem += bt * N * N * mask_bytes * db              # mask block
        # f32 intermediates: proj, scores, e, out (q/k/v are views of proj)
        vmem += rows * 3 * Hp * 4
        vmem += 2 * bt * N * N * 4
        vmem += bt * N * Hp * 4
        return vmem

    divisors = [d for d in range(1, B + 1) if B % d == 0]
    aligned = [d for d in divisors if (d * N) % 8 == 0] or divisors
    fitting = [d for d in aligned if step_bytes(d) <= vmem_budget_bytes]
    bt = max(fitting) if fitting else min(aligned)
    # Only on 2-TensorCore parts (v7x): keep >= 2 grid steps so both cores work.
    if n_cores >= 2 and B // bt < n_cores:
        split = [d for d in (fitting or aligned) if B // d >= n_cores]
        if split:
            bt = max(split)
    return bt


# --------------------------------------------------------------------------- #
# Forward wrapper
# --------------------------------------------------------------------------- #
def att_model_forward(x, mask, params, *, compute_dtype=None, block_b=None,
                      vmem_limit_bytes=None, binary_mask=True):
    """x: (B, N, Din); mask: (B, N, N) (any dtype; int8 recommended for binary
    masks -- 4x less HBM traffic than f32) or None.

    binary_mask=True assumes mask values are {0,1} and uses a select (exact for
    binary masks).  Pass binary_mask=False for general masks (original clamp
    arithmetic, mask widened to f32 in-kernel).

    compute_dtype=jnp.bfloat16 feeds bf16 MXU inputs (f32 accumulation).  Only
    worthwhile when Din and hidden_dim are >=128; at small dims the extra casts
    are pure VPU overhead (and v5e has no bf16 VPU).  It is an approximation,
    not bit-parity with the f32 PyTorch module."""
    B, N, Din = x.shape
    out_dtype = x.dtype

    packed = params if "w_qkv" in params else pack_params(
        params, compute_dtype=compute_dtype)
    hidden, hp = packed["hidden"], packed["hidden_pad"]
    w_qkv, b_qkv = packed["w_qkv"], packed["b_qkv"]

    if compute_dtype is not None:
        x = x.astype(compute_dtype)
        w_qkv = w_qkv.astype(compute_dtype)

    x_bytes = jnp.dtype(x.dtype).itemsize
    out_bytes = jnp.dtype(out_dtype).itemsize
    mask_bytes = 0 if mask is None else jnp.dtype(mask.dtype).itemsize

    scoped = vmem_limit_bytes if vmem_limit_bytes is not None else _default_scoped_vmem_bytes()
    budget = int(scoped * 0.7)

    bt = block_b if block_b is not None else _choose_block_b(
        B, N, Din, hidden, hp, x_bytes, mask_bytes, out_bytes, budget,
        _tensorcores_per_chip())
    assert B % bt == 0, "block_b must divide batch"
    grid = (B // bt,)

    # Wrapper-side flatten: free (identical HBM layout); the kernel gets a
    # contiguous 2D tile with no in-kernel sublane-merging reshape.
    x2 = x.reshape(B * N, Din)

    x_spec = pl.BlockSpec((bt * N, Din), lambda b: (b, 0))
    w_spec = pl.BlockSpec((Din, 3 * hp), lambda b: (0, 0))
    b_spec = pl.BlockSpec((1, 3 * hp), lambda b: (0, 0))
    o_spec = pl.BlockSpec((bt, N, hidden), lambda b: (b, 0, 0))

    cp_kwargs = dict(dimension_semantics=("parallel",))
    if vmem_limit_bytes is not None:
        cp_kwargs["vmem_limit_bytes"] = vmem_limit_bytes
    compiler_params = pltpu.CompilerParams(**cp_kwargs)

    out_shape = jax.ShapeDtypeStruct((B, N, hidden), out_dtype)

    if mask is None:
        kernel = _make_kernel(N, hidden, hp, has_mask=False, binary_mask=False)
        return pl.pallas_call(
            kernel,
            out_shape=out_shape,
            grid_spec=pltpu.PrefetchScalarGridSpec(
                num_scalar_prefetch=0, grid=grid,
                in_specs=[x_spec, w_spec, b_spec],
                out_specs=o_spec),
            compiler_params=compiler_params,
        )(x2, w_qkv, b_qkv)

    m_spec = pl.BlockSpec((bt, N, N), lambda b: (b, 0, 0))
    kernel = _make_kernel(N, hidden, hp, has_mask=True, binary_mask=binary_mask)
    return pl.pallas_call(
        kernel,
        out_shape=out_shape,
        grid_spec=pltpu.PrefetchScalarGridSpec(
            num_scalar_prefetch=0, grid=grid,
            in_specs=[x_spec, m_spec, w_spec, b_spec],
            out_specs=o_spec),
        compiler_params=compiler_params,
    )(x2, mask, w_qkv, b_qkv)


# --------------------------------------------------------------------------- #
# Parameter init (PyTorch nn.Linear-style) and pure-JAX reference
# --------------------------------------------------------------------------- #
def init_params(key, n_node, din, hidden_dim, dout):
    ks = jax.random.split(key, 8)
    scale_in = 1.0 / jnp.sqrt(din)
    scale_h = 1.0 / jnp.sqrt(hidden_dim)
    return {
        # stored transposed relative to PyTorch nn.Linear: (in, out)
        "wv": jax.random.uniform(ks[0], (din, hidden_dim), jnp.float32, -scale_in, scale_in),
        "bv": jax.random.uniform(ks[1], (hidden_dim,), jnp.float32, -scale_in, scale_in),
        "wk": jax.random.uniform(ks[2], (din, hidden_dim), jnp.float32, -scale_in, scale_in),
        "bk": jax.random.uniform(ks[3], (hidden_dim,), jnp.float32, -scale_in, scale_in),
        "wq": jax.random.uniform(ks[4], (din, hidden_dim), jnp.float32, -scale_in, scale_in),
        "bq": jax.random.uniform(ks[5], (hidden_dim,), jnp.float32, -scale_in, scale_in),
        # fcout: defined in the module's __init__ but unused in forward (kept for parity)
        "wout": jax.random.uniform(ks[6], (hidden_dim, dout), jnp.float32, -scale_h, scale_h),
        "bout": jax.random.uniform(ks[7], (dout,), jnp.float32, -scale_h, scale_h),
    }


def _reference(x, mask, params):
    def lin(x, w, b):
        return jnp.maximum(jnp.einsum("bnd,dh->bnh", x, w) + b, 0.0)
    v = lin(x, params["wv"], params["bv"])
    q = lin(x, params["wq"], params["bq"])
    k = lin(x, params["wk"], params["bk"])
    scores = jnp.einsum("bnh,bmh->bnm", q, k)
    if mask is not None:
        m = mask.astype(jnp.float32)
        h = jnp.clip(scores * m, 0.0, 9.0e13) - 9.0e15 * (1.0 - m)
    else:
        h = jnp.clip(scores, 0.0, 9.0e13)
    att = jax.nn.softmax(h, axis=2)
    return jnp.einsum("bnm,bmh->bnh", att, v)


# --------------------------------------------------------------------------- #
if __name__ == "__main__":
    key = jax.random.PRNGKey(0)
    # batch, n_node, din, hidden_dim, dout (dout only feeds the unused fcout)
    B, N, Din, H, Dout = 8, 8, 32, 32, 32

    k_params, k_x, k_m = jax.random.split(key, 3)
    params = init_params(k_params, N, Din, H, Dout)
    packed = pack_params(params)      # pack/pad weights once (hoisted out of forward)

    x = jax.random.normal(k_x, (B, N, Din), dtype=jnp.float32)

    # Binary adjacency-style mask with self-connections.
    mask_f32 = (jax.random.uniform(k_m, (B, N, N)) > 0.5).astype(jnp.float32)
    mask_f32 = jnp.maximum(mask_f32, jnp.eye(N, dtype=jnp.float32)[None])
    mask_i8 = mask_f32.astype(jnp.int8)   # int8 transport: 4x less HBM than f32

    ref = _reference(x, mask_f32, params)

    # 1) binary int8 mask, select-based masking
    out = jax.block_until_ready(att_model_forward(x, mask_i8, packed))
    assert out.shape == (B, N, H)
    assert jnp.allclose(out, ref, atol=1e-2, rtol=1e-2), "masked (binary/int8) mismatch"

    # 2) general-mask fallback (f32 mask, original clamp arithmetic)
    out_g = jax.block_until_ready(
        att_model_forward(x, mask_f32, packed, binary_mask=False))
    assert jnp.allclose(out_g, ref, atol=1e-2, rtol=1e-2), "masked (general) mismatch"

    # 3) mask=None path: no (B,N,N) tensor is materialized or DMA'd
    out_nm = jax.block_until_ready(att_model_forward(x, None, packed))
    ref_nm = _reference(x, None, params)
    assert jnp.allclose(out_nm, ref_nm, atol=1e-2, rtol=1e-2), "no-mask mismatch"

    print("KERNEL_OK")
</pallas_src>

<mosaic_0001>
module attributes {stable_mosaic.version = 11 : i64} {
  func.func @kernel(%arg0: i32, %arg1: memref<64x32xf32, #tpu.memory_space<vmem>>, %arg2: memref<8x8x8xi8, #tpu.memory_space<vmem>>, %arg3: memref<32x384xf32, #tpu.memory_space<vmem>>, %arg4: memref<1x384xf32, #tpu.memory_space<vmem>>, %arg5: memref<8x8x32xf32, #tpu.memory_space<vmem>>) attributes {dimension_semantics = [#tpu.dimension_semantics<parallel>], iteration_bounds = array<i64: 1>, scalar_prefetch = 0 : i64, scratch_operands = 0 : i64, tpu.core_type = #tpu.core_type<tc>, window_params = [{transform_indices = @transform_0, window_bounds = array<i64: 64, 32>}, {transform_indices = @transform_1, window_bounds = array<i64: 8, 8, 8>}, {pipeline_mode = #tpu.pipeline_mode<synchronous>, transform_indices = @transform_2, window_bounds = array<i64: 32, 384>}, {pipeline_mode = #tpu.pipeline_mode<synchronous>, transform_indices = @transform_3, window_bounds = array<i64: 1, 384>}, {transform_indices = @transform_4, window_bounds = array<i64: 8, 8, 32>}]} {
    %c0 = arith.constant 0 : index
    %c0_0 = arith.constant 0 : index
    %0 = vector.load %arg1[%c0, %c0_0] : memref<64x32xf32, #tpu.memory_space<vmem>>, vector<64x32xf32>
    %c0_1 = arith.constant 0 : index
    %c0_2 = arith.constant 0 : index
    %1 = vector.load %arg3[%c0_1, %c0_2] : memref<32x384xf32, #tpu.memory_space<vmem>>, vector<32x384xf32>
    %cst = arith.constant dense<0.000000e+00> : vector<64x384xf32>
    %2 = tpu.matmul %0, %1, %cst {dimension_numbers = #tpu.dot_dimension_numbers<[1], [0], [0], [1], [0, 0, 1, 1], [], []>} : vector<64x32xf32>, vector<32x384xf32>, vector<64x384xf32> -> vector<64x384xf32>
    %c0_3 = arith.constant 0 : index
    %c0_4 = arith.constant 0 : index
    %3 = vector.load %arg4[%c0_3, %c0_4] : memref<1x384xf32, #tpu.memory_space<vmem>>, vector<1x384xf32>
    %4 = vector.broadcast %3 : vector<1x384xf32> to vector<64x384xf32>
    %5 = arith.addf %2, %4 : vector<64x384xf32>
    %cst_5 = arith.constant 0.000000e+00 : f32
    %6 = vector.broadcast %cst_5 : f32 to vector<64x384xf32>
    %7 = arith.maximumf %5, %6 : vector<64x384xf32>
    %8 = vector.extract_strided_slice %7 {offsets = [0, 0], sizes = [64, 128], strides = [1, 1]} : vector<64x384xf32> to vector<64x128xf32>
    %9 = vector.shape_cast %8 : vector<64x128xf32> to vector<8x8x128xf32>
    %10 = vector.extract_strided_slice %7 {offsets = [0, 128], sizes = [64, 128], strides = [1, 1]} : vector<64x384xf32> to vector<64x128xf32>
    %11 = vector.shape_cast %10 : vector<64x128xf32> to vector<8x8x128xf32>
    %12 = vector.extract_strided_slice %7 {offsets = [0, 256], sizes = [64, 128], strides = [1, 1]} : vector<64x384xf32> to vector<64x128xf32>
    %13 = vector.shape_cast %12 : vector<64x128xf32> to vector<8x8x128xf32>
    %cst_6 = arith.constant dense<0.000000e+00> : vector<8x8x8xf32>
    %14 = tpu.matmul %11, %13, %cst_6 {dimension_numbers = #tpu.dot_dimension_numbers<[2], [2], [1], [1], [0, 0, 0, 1, 1, 1], [0], [0]>} : vector<8x8x128xf32>, vector<8x8x128xf32>, vector<8x8x8xf32> -> vector<8x8x8xf32>
    %c0_7 = arith.constant 0 : index
    %c0_8 = arith.constant 0 : index
    %c0_9 = arith.constant 0 : index
    %15 = vector.load %arg2[%c0_7, %c0_8, %c0_9] : memref<8x8x8xi8, #tpu.memory_space<vmem>>, vector<8x8x8xi8>
    %c0_i8 = arith.constant 0 : i8
    %16 = vector.broadcast %c0_i8 : i8 to vector<8x8x8xi8>
    %17 = arith.cmpi ne, %15, %16 : vector<8x8x8xi8>
    %cst_10 = arith.constant 0.000000e+00 : f32
    %cst_11 = arith.constant 8.99999995E+13 : f32
    %18 = vector.broadcast %cst_10 : f32 to vector<8x8x8xf32>
    %19 = arith.maximumf %18, %14 : vector<8x8x8xf32>
    %20 = vector.broadcast %cst_11 : f32 to vector<8x8x8xf32>
    %21 = arith.minimumf %20, %19 : vector<8x8x8xf32>
    %cst_12 = arith.constant -9.000000e+15 : f32
    %22 = vector.broadcast %cst_12 : f32 to vector<8x8x8xf32>
    %23 = arith.select %17, %21, %22 : vector<8x8x8xi1>, vector<8x8x8xf32>
    %cst_13 = arith.constant dense<0xFF800000> : vector<8x8xf32>
    %24 = vector.multi_reduction <maximumf>, %23, %cst_13 [2] : vector<8x8x8xf32> to vector<8x8xf32>
    %25 = vector.shape_cast %24 : vector<8x8xf32> to vector<8x8x1xf32>
    %26 = vector.broadcast %25 : vector<8x8x1xf32> to vector<8x8x8xf32>
    %27 = arith.subf %23, %26 : vector<8x8x8xf32>
    %28 = math.exp %27 : vector<8x8x8xf32>
    %cst_14 = arith.constant dense<0.000000e+00> : vector<8x8xf32>
    %29 = vector.multi_reduction <add>, %28, %cst_14 [2] : vector<8x8x8xf32> to vector<8x8xf32>
    %30 = vector.shape_cast %29 : vector<8x8xf32> to vector<8x8x1xf32>
    %cst_15 = arith.constant dense<0.000000e+00> : vector<8x8x128xf32>
    %31 = tpu.matmul %28, %9, %cst_15 {dimension_numbers = #tpu.dot_dimension_numbers<[2], [1], [1], [2], [0, 0, 0, 1, 1, 2], [0], [0]>} : vector<8x8x8xf32>, vector<8x8x128xf32>, vector<8x8x128xf32> -> vector<8x8x128xf32>
    %32 = tpu.reciprocal %30 : vector<8x8x1xf32> -> vector<8x8x1xf32>
    %33 = vector.broadcast %32 : vector<8x8x1xf32> to vector<8x8x128xf32>
    %34 = arith.mulf %31, %33 : vector<8x8x128xf32>
    %35 = vector.extract_strided_slice %34 {offsets = [0, 0, 0], sizes = [8, 8, 32], strides = [1, 1, 1]} : vector<8x8x128xf32> to vector<8x8x32xf32>
    %c0_16 = arith.constant 0 : index
    %c0_17 = arith.constant 0 : index
    %c0_18 = arith.constant 0 : index
    %36 = vector.load %arg5[%c0_16, %c0_17, %c0_18] : memref<8x8x32xf32, #tpu.memory_space<vmem>>, vector<8x8x32xf32>
    tpu.vector_store %arg5[%c0_16, %c0_17, %c0_18], %35 {strides = array<i32>} : memref<8x8x32xf32, #tpu.memory_space<vmem>>, vector<8x8x32xf32>,
    return
  }
  func.func @transform_0(%arg0: i32) -> (i32, i32) {
    %c0_i32 = arith.constant 0 : i32
    %c0_i32_0 = arith.constant 0 : i32
    return %arg0, %c0_i32 : i32, i32
  }
  func.func @transform_1(%arg0: i32) -> (i32, i32, i32) {
    %c0_i32 = arith.constant 0 : i32
    %c0_i32_0 = arith.constant 0 : i32
    %c0_i32_1 = arith.constant 0 : i32
    return %arg0, %c0_i32, %c0_i32_0 : i32, i32, i32
  }
  func.func @transform_2(%arg0: i32) -> (i32, i32) {
    %c0_i32 = arith.constant 0 : i32
    %c0_i32_0 = arith.constant 0 : i32
    %c0_i32_1 = arith.constant 0 : i32
    return %c0_i32, %c0_i32_0 : i32, i32
  }
  func.func @transform_3(%arg0: i32) -> (i32, i32) {
    %c0_i32 = arith.constant 0 : i32
    %c0_i32_0 = arith.constant 0 : i32
    %c0_i32_1 = arith.constant 0 : i32
    return %c0_i32, %c0_i32_0 : i32, i32
  }
  func.func @transform_4(%arg0: i32) -> (i32, i32, i32) {
    %c0_i32 = arith.constant 0 : i32
    %c0_i32_0 = arith.constant 0 : i32
    %c0_i32_1 = arith.constant 0 : i32
    return %arg0, %c0_i32, %c0_i32_0 : i32, i32, i32
  }
}

</mosaic_0001>

<bundles_post_ra>
// kernel: tpu_custom_call.1
= control target key start
LH: loop header
LB: loop body
LE: loop exit
PB: predicated region body
PF: predicated region fallthrough
CT: control target
= control target key end

     0   :  { %9 = vsyncpa [#allocation3], 0  ;;  %s1302_s0 = inlined_call_operand.vmem [shape: f32[64,32], index: 0, kind: input, shape index: {}]   ;;  %s1303_s1 = inlined_call_operand.hbm [shape: s8[8,8,8], index: 1, kind: input, shape index: {}]   ;;  %s1304_s2 = inlined_call_operand.vmem [shape: f32[32,384], index: 2, kind: input, shape index: {}]   ;;  %s1305_s3 = inlined_call_operand.hbm [shape: f32[1,384], index: 3, kind: input, shape index: {}]   ;;  %s1306_s4 = inlined_call_operand.hbm [shape: f32[8,8,32], index: 4, kind: output, shape index: {}]  }
   0x1   :  { %10 = vsyncpa [#allocation6], 0 }
   0x2   :  { %11 = vsyncpa [#allocation4], 0  ;;  %s18_s17 = sshll.u32 %s1303_s1, 4  ;;  %s1029_s18 = smov [#allocation2]   ;;  %s19_s17 = int_to_ptr.hbm [resolvable:$true] %s18_s17 }
   0x3   :  { %s20_s19 = sshll.u32 %s1029_s18, 4  ;;  %s34_s22 = sshll.u32 %s1305_s3, 4  ;;  %s21_s19 = int_to_ptr.vmem [resolvable:$true] %s20_s19  ;;  %s35_s22 = int_to_ptr.hbm [resolvable:$true] %s34_s22 }
   0x4   :  { %s1030_s23 = smov 32   ;;  %s1031_s24 = smov 2  }
   0x5   :  { %26 = dma.hbm_to_vmem [thread:$0]  %s19_s17, 256, %s21_s19, [#allocation3], %s1030_s23, %s1030_s23, %s1031_s24  }
   0x6   :  { %s1032_s25 = smov [#allocation5]  }
   0x7   :  { %s36_s26 = sshll.u32 %s1032_s25, 4  ;;  %s37_s26 = int_to_ptr.vmem [resolvable:$true] %s36_s26 }
   0x8   :  { %39 = dma.hbm_to_vmem [thread:$0]  %s35_s22, 48, %s37_s26, [#allocation6]  }
   0x9   :  { %1023 = dma.done.wait [#allocation3], 256  }
   0xa   :  { %1024 = vsyncadd [#allocation3], 4294967040 }
   0xb   :  { %1025 = dma.done.wait [#allocation6], 48  }
   0xc   :  { %1026 = vsyncadd [#allocation6], 4294967248  ;;  %v69_v0 = vld [vmem:[%s1304_s2 + $0x58] sm:$0xff]  ;;  %v66_v1 = vld [vmem:[%s1304_s2 + $0x40] sm:$0xff]  ;;  %vm78_vm0 = vcmask 261120   ;;  %vm474_vm4 = vcmask 64512  }
   0xd   :  { %197 = vmatpush.msra.mxu2 %v69_v0  ;;  %v68_v2 = vld [vmem:[%s1304_s2 + $0x50] sm:$0xff]  ;;  %v63_v3 = vld [vmem:[%s1304_s2 + $0x28] sm:$0xff]  ;;  %v65_v4 = vld [vmem:[%s1304_s2 + $0x38] sm:$0xff]  ;;  %s865_s13 = sshll.u32 %s1306_s4, 4  ;;  %s1035_s14 = smov 128   ;;  %s866_s13 = int_to_ptr.hbm [resolvable:$true] %s865_s13 }
   0xe   :  { %156 = vmatpush.msra.mxu1 %v68_v2  ;;  %v62_v5 = vld [vmem:[%s1304_s2 + $0x20] sm:$0xff]  ;;  %v60_v6 = vld [vmem:[%s1304_s2 + $0x10] sm:$0xff]  ;;  %v59_v8 = vld [vmem:[%s1304_s2 + $0x8] sm:$0xff]  ;;  %s1036_s15 = smov 8  }
   0xf   :  { %198 = vmatpush.msra.mxu2 %v66_v1  ;;  %v1092_v7 = vld [vmem:[%s1302_s0] sm:$0xff]  ;;  %v1104_v9 = vld [vmem:[%s1302_s0 + $0x8] sm:$0xff]  ;;  %v1113_v10 = vld [vmem:[%s1302_s0 + $0x10] sm:$0xff] }
  0x10   :  { %157 = vmatpush.msra.mxu1 %v65_v4  ;;  %v1122_v11 = vld [vmem:[%s1302_s0 + $0x18] sm:$0xff]  ;;  %v1131_v12 = vld [vmem:[%s1302_s0 + $0x20] sm:$0xff]  ;;  %v1140_v13 = vld [vmem:[%s1302_s0 + $0x28] sm:$0xff] }
  0x11   :  { %199 = vmatpush.msra.mxu2 %v63_v3  ;;  %v1149_v14 = vld [vmem:[%s1302_s0 + $0x30] sm:$0xff]  ;;  %v1158_v15 = vld [vmem:[%s1302_s0 + $0x38] sm:$0xff]  ;;  %v67_v46 = vld [vmem:[%s1304_s2 + $0x48] sm:$0xff] }
  0x12   :  { %158 = vmatpush.msra.mxu1 %v62_v5  ;;  %v1164_v16 = vld [vmem:[#allocation5] sm:$0x7]  ;;  %115 = vmatpush.msra.mxu0 %v67_v46  ;;  %v61_v49 = vld [vmem:[%s1304_s2 + $0x18] sm:$0xff]  ;;  %v58_v53 = vld [vmem:[%s1304_s2] sm:$0xff] }
  0x13   :  { %200 = vmatpush.msra.mxu2 %v60_v6  ;;  %v1167_v18 = vperm.slane %v1164_v16, 1  ;;  %v1170_v19 = vperm.slane %v1164_v16, 2  ;;  %v64_v47 = vld [vmem:[%s1304_s2 + $0x30] sm:$0xff]  ;;  %s1034_s2 = smov [#allocation7]  }
  0x14   :  { %895 = vmatmul.msk.f32.vlgmr.msra.gmra.mxu2 %vm78_vm0, %v1092_v7  ;;  %159 = vmatpush.msra.mxu1 %v59_v8  ;;  %v1033_v8 = vmov 0   ;;  %s863_s10 = sshll.u32 %s1034_s2, 4  ;;  %s864_s10 = int_to_ptr.vmem [resolvable:$true] %s863_s10 }
  0x15   :  { %887 = vmatmul.msk.f32.vlgmr.msra.gmra.mxu1 %vm78_vm0, %v1092_v7  ;;  %116 = vmatpush.msra.mxu0 %v64_v47 }
  0x17   :  { %117 = vmatpush.msra.mxu0 %v61_v49 }
  0x19   :  { %118 = vmatpush.msra.mxu0 %v58_v53 }
  0x1a   :  { %879 = vmatmul.msk.f32.vlgmr.msra.gmra.mxu0 %vm78_vm0, %v1092_v7  ;;  %v410_v7 = vld [vmem:[#allocation2] sm:$0x3] }
  0x1b   :  { %vm418_vm1 = vnez %v410_v7 }
  0x1c   :  { %896 = vmatmul.msk.f32.gmra.mxu2 %vm78_vm0, %v1104_v9 }
  0x1d   :  { %888 = vmatmul.msk.f32.gmra.mxu1 %vm78_vm0, %v1104_v9 }
  0x22   :  { %880 = vmatmul.msk.f32.gmra.mxu0 %vm78_vm0, %v1104_v9  ;;  %v442_v9 = vsel %vm418_vm1, 16843009, %v1033_v8 }
  0x24   :  { %897 = vmatmul.msk.f32.gmra.mxu2 %vm78_vm0, %v1113_v10 }
  0x25   :  { %889 = vmatmul.msk.f32.gmra.mxu1 %vm78_vm0, %v1113_v10 }
  0x2a   :  { %881 = vmatmul.msk.f32.gmra.mxu0 %vm78_vm0, %v1113_v10  ;;  %v411_v10 = vld [vmem:[#allocation2 + $0x2] sm:$0x3] }
  0x2b   :  { %vm419_vm2 = vnez %v411_v10 }
  0x2c   :  { %898 = vmatmul.msk.f32.gmra.mxu2 %vm78_vm0, %v1122_v11 }
  0x2d   :  { %890 = vmatmul.msk.f32.gmra.mxu1 %vm78_vm0, %v1122_v11 }
  0x32   :  { %882 = vmatmul.msk.f32.gmra.mxu0 %vm78_vm0, %v1122_v11 }
  0x34   :  { %899 = vmatmul.msk.f32.gmra.mxu2 %vm78_vm0, %v1131_v12 }
  0x35   :  { %891 = vmatmul.msk.f32.gmra.mxu1 %vm78_vm0, %v1131_v12 }
  0x3a   :  { %883 = vmatmul.msk.f32.gmra.mxu0 %vm78_vm0, %v1131_v12 }
  0x3c   :  { %900 = vmatmul.msk.f32.gmra.mxu2 %vm78_vm0, %v1140_v13 }
  0x3d   :  { %892 = vmatmul.msk.f32.gmra.mxu1 %vm78_vm0, %v1140_v13 }
  0x42   :  { %884 = vmatmul.msk.f32.gmra.mxu0 %vm78_vm0, %v1140_v13  ;;  %v443_v13 = vsel %vm419_vm2, 16843009, %v1033_v8 }
  0x44   :  { %901 = vmatmul.msk.f32.gmra.mxu2 %vm78_vm0, %v1149_v14 }
  0x45   :  { %893 = vmatmul.msk.f32.gmra.mxu1 %vm78_vm0, %v1149_v14 }
  0x4a   :  { %885 = vmatmul.msk.f32.gmra.mxu0 %vm78_vm0, %v1149_v14  ;;  %v412_v14 = vld [vmem:[#allocation2 + $0x4] sm:$0x3] }
  0x4b   :  { %vm420_vm5 = vnez %v412_v14 }
  0x4c   :  { %902 = vmatmul.msk.f32.gmra.mxu2 %vm78_vm0, %v1158_v15 }
  0x4d   :  { %894 = vmatmul.msk.f32.gmra.mxu1 %vm78_vm0, %v1158_v15 }
  0x52   :  { %886 = vmatmul.msk.f32.gmra.mxu0 %vm78_vm0, %v1158_v15 }
  0x92   :  { %v161_v17 = vpop.f32.mrf.mxu1 }
  0x93   :  { %v162_v21 = vadd.f32 %v161_v17, %v1167_v18  ;;  %v450_v17 = vunpack.c.0.s8 %v442_v9 }
  0x95   :  { %v227_v25 = vmax.f32 %v162_v21, 0.0  ;;  %vm458_vm3 = vcmp.ne.s32.totalorder %v450_v17, 0 }
  0x97   :  { %v202_v20 = vpop.f32.mrf.mxu2  ;;  %v120_v46 = vpop.f32.mrf.mxu0 }
  0x98   :  { %v203_v22 = vadd.f32 %v202_v20, %v1170_v19  ;;  %v451_v20 = vunpack.c.0.s8 %v443_v13 }
  0x9a   :  { %v228_v23 = vmax.f32 %v203_v22, 0.0  ;;  %v164_v24 = vpop.f32.mrf.mxu1  ;;  %vm459_vm6 = vcmp.ne.s32.totalorder %v451_v20, 0 }
  0x9b   :  { %v165_v27 = vadd.f32 %v164_v24, %v1167_v18  ;;  %v444_v24 = vsel %vm420_vm5, 16843009, %v1033_v8 }
  0x9c   :  { %265 = vmatpush.xpose.msra.mxu3 %v228_v23 }
  0x9d   :  { %v230_v31 = vmax.f32 %v165_v27, 0.0 }
  0x9f   :  { %v205_v26 = vpop.f32.mrf.mxu2  ;;  %266 = vmatmul.f32.vlgmr.msra.gmra.mxu3 %v227_v25 }
  0xa0   :  { %v206_v28 = vadd.f32 %v205_v26, %v1170_v19  ;;  %v413_v26 = vld [vmem:[#allocation2 + $0x6] sm:$0x3] }
  0xa1   :  { %vm421_vm7 = vnez %v413_v26 }
  0xa2   :  { %v231_v29 = vmax.f32 %v206_v28, 0.0  ;;  %v167_v30 = vpop.f32.mrf.mxu1  ;;  %v452_v28 = vunpack.c.0.s8 %v444_v24 }
  0xa3   :  { %v168_v33 = vadd.f32 %v167_v30, %v1167_v18 }
  0xa4   :  { %285 = vmatpush.xpose.msrb.mxu3 %v231_v29  ;;  %vm460_vm8 = vcmp.ne.s32.totalorder %v452_v28, 0 }
  0xa5   :  { %v233_v37 = vmax.f32 %v168_v33, 0.0 }
  0xa7   :  { %v208_v32 = vpop.f32.mrf.mxu2  ;;  %286 = vmatmul.f32.vlgmr.msrb.gmra.mxu3 %v230_v31 }
  0xa8   :  { %v209_v34 = vadd.f32 %v208_v32, %v1170_v19  ;;  %v445_v32 = vsel %vm421_vm7, 16843009, %v1033_v8 }
  0xaa   :  { %v234_v35 = vmax.f32 %v209_v34, 0.0  ;;  %v170_v36 = vpop.f32.mrf.mxu1  ;;  %v414_v34 = vld [vmem:[#allocation2 + $0x8] sm:$0x3] }
  0xab   :  { %v171_v39 = vadd.f32 %v170_v36, %v1167_v18  ;;  %v453_v36 = vunpack.c.0.s8 %v445_v32  ;;  %vm422_vm9 = vnez %v414_v34 }
  0xac   :  { %305 = vmatpush.xpose.msra.mxu3 %v234_v35 }
  0xad   :  { %v236_v43 = vmax.f32 %v171_v39, 0.0  ;;  %vm461_vm10 = vcmp.ne.s32.totalorder %v453_v36, 0 }
  0xaf   :  { %v211_v38 = vpop.f32.mrf.mxu2  ;;  %306 = vmatmul.f32.vlgmr.msra.gmra.mxu3 %v233_v37 }
  0xb0   :  { %v212_v40 = vadd.f32 %v211_v38, %v1170_v19 }
  0xb2   :  { %v237_v41 = vmax.f32 %v212_v40, 0.0  ;;  %v173_v42 = vpop.f32.mrf.mxu1  ;;  %v446_v40 = vsel %vm422_vm9, 16843009, %v1033_v8 }
  0xb3   :  { %v174_v45 = vadd.f32 %v173_v42, %v1167_v18  ;;  %v415_v42 = vld [vmem:[#allocation2 + $0xa] sm:$0x3] }
  0xb4   :  { %325 = vmatpush.xpose.msrb.mxu3 %v237_v41  ;;  %vm423_vm11 = vnez %v415_v42 }
  0xb5   :  { %v239_v52 = vmax.f32 %v174_v45, 0.0  ;;  %v1238_v45 = vperm.slane %v1164_v16, 0 }
  0xb7   :  { %v214_v44 = vpop.f32.mrf.mxu2  ;;  %326 = vmatmul.f32.vlgmr.msrb.gmra.mxu3 %v236_v43  ;;  %v121_v49 = vadd.f32 %v120_v46, %v1238_v45 }
  0xb8   :  { %v215_v48 = vadd.f32 %v214_v44, %v1170_v19  ;;  %v454_v44 = vunpack.c.0.s8 %v446_v40 }
  0xba   :  { %v240_v50 = vmax.f32 %v215_v48, 0.0  ;;  %v176_v51 = vpop.f32.mrf.mxu1  ;;  %vm462_vm12 = vcmp.ne.s32.totalorder %v454_v44, 0 }
  0xbb   :  { %v177_v55 = vadd.f32 %v176_v51, %v1167_v18  ;;  %v447_v51 = vsel %vm423_vm11, 16843009, %v1033_v8 }
  0xbc   :  { %345 = vmatpush.xpose.msra.mxu3 %v240_v50  ;;  %v455_v16 = vunpack.c.0.s8 %v447_v51 }
  0xbd   :  { %v242_v59 = vmax.f32 %v177_v55, 0.0 }
  0xbe   :  { %vm463_vm14 = vcmp.ne.s32.totalorder %v455_v16, 0 }
  0xbf   :  { %v217_v54 = vpop.f32.mrf.mxu2  ;;  %346 = vmatmul.f32.vlgmr.msra.gmra.mxu3 %v239_v52  ;;  %v226_v52 = vmax.f32 %v121_v49, 0.0 }
  0xc0   :  { %v218_v56 = vadd.f32 %v217_v54, %v1170_v19  ;;  %v416_v54 = vld [vmem:[#allocation2 + $0xc] sm:$0x3] }
  0xc1   :  { %vm424_vm13 = vnez %v416_v54 }
  0xc2   :  { %v243_v57 = vmax.f32 %v218_v56, 0.0  ;;  %v179_v58 = vpop.f32.mrf.mxu1  ;;  %v123_v56 = vpop.f32.mrf.mxu0 }
  0xc3   :  { %v180_v61 = vadd.f32 %v179_v58, %v1167_v18  ;;  %v124_v58 = vadd.f32 %v123_v56, %v1238_v45 }
  0xc4   :  { %365 = vmatpush.xpose.msrb.mxu3 %v243_v57 }
  0xc5   :  { %v245_v0 = vmax.f32 %v180_v61, 0.0 }
  0xc7   :  { %v220_v60 = vpop.f32.mrf.mxu2  ;;  %366 = vmatmul.f32.vlgmr.msrb.gmra.mxu3 %v242_v59 }
  0xc8   :  { %v221_v62 = vadd.f32 %v220_v60, %v1170_v19  ;;  %v229_v60 = vmax.f32 %v124_v58, 0.0 }
  0xca   :  { %v246_v63 = vmax.f32 %v221_v62, 0.0  ;;  %v182_v1 = vpop.f32.mrf.mxu1  ;;  %v448_v62 = vsel %vm424_vm13, 16843009, %v1033_v8  ;;  %588 = vmatpush.msrb.mxu0 %v229_v60 }
  0xcb   :  { %v183_v3 = vadd.f32 %v182_v1, %v1167_v18 }
  0xcc   :  { %385 = vmatpush.xpose.msra.mxu3 %v246_v63 }
  0xcd   :  { %v248_v6 = vmax.f32 %v183_v3, 0.0  ;;  %v126_v3 = vpop.f32.mrf.mxu0 }
  0xcf   :  { %v223_v2 = vpop.f32.mrf.mxu2  ;;  %386 = vmatmul.f32.vlgmr.msra.gmra.mxu3 %v245_v0  ;;  %v417_v0 = vld [vmem:[#allocation2 + $0xe] sm:$0x3] }
  0xd0   :  { %v224_v4 = vadd.f32 %v223_v2, %v1170_v19  ;;  %v456_v2 = vunpack.c.0.s8 %v448_v62  ;;  %vm425_vm15 = vnez %v417_v0 }
  0xd1   :  { %v449_v10 = vsel %vm425_vm15, 16843009, %v1033_v8 }
  0xd2   :  { %v249_v5 = vmax.f32 %v224_v4, 0.0  ;;  %vm464_vm1 = vcmp.ne.s32.totalorder %v456_v2, 0 }
  0xd4   :  { %405 = vmatpush.xpose.msrb.mxu3 %v249_v5  ;;  %v127_v5 = vadd.f32 %v126_v3, %v1238_v45 }
  0xd6   :  { %v232_v7 = vmax.f32 %v127_v5, 0.0 }
  0xd7   :  { %406 = vmatmul.f32.vlgmr.msrb.gmra.mxu3 %v248_v6 }
  0xd8   :  { %565 = vmatpush.msra.mxu3 %v226_v52  ;;  %611 = vmatpush.msrb.mxu1 %v232_v7 }
 0x122   :  { %v267_v11 = vpop.f32.mrf.mxu3 }
 0x123   :  { %v426_v18 = vmax.f32 %v267_v11, 0.0 }
 0x125   :  { %v434_v12 = vmin.f32 %v426_v18, 9e+13  ;;  %v457_v18 = vunpack.c.0.s8 %v449_v10 }
 0x127   :  { %v1218_v19 = vsel %vm458_vm3, %v434_v12, -9e+15  ;;  %v129_v12 = vpop.f32.mrf.mxu0  ;;  %vm465_vm2 = vcmp.ne.s32.totalorder %v457_v18, 0 }
 0x128   :  { %v475_v15 = vsel %vm474_vm4, %v1218_v19, -inf  ;;  %v130_v14 = vadd.f32 %v129_v12, %v1238_v45 }
 0x129   :  { %476 = vmax.xlane.f32.xlu0 %v475_v15 }
 0x12a   :  { %v287_v21 = vpop.f32.mrf.mxu3  ;;  %v235_v20 = vmax.f32 %v130_v14, 0.0 }
 0x12b   :  { %v427_v22 = vmax.f32 %v287_v21, 0.0 }
 0x12c   :  { %634 = vmatpush.msrb.mxu2 %v235_v20 }
 0x12d   :  { %v435_v23 = vmin.f32 %v427_v22, 9e+13 }
 0x12f   :  { %v1223_v25 = vsel %vm459_vm6, %v435_v23, -9e+15 }
 0x130   :  { %v478_v27 = vsel %vm474_vm4, %v1223_v25, -inf }
 0x131   :  { %479 = vmax.xlane.f32.xlu1 %v478_v27  ;;  %v132_v27 = vpop.f32.mrf.mxu0 }
 0x132   :  { %v307_v29 = vpop.f32.mrf.mxu3  ;;  %v133_v28 = vadd.f32 %v132_v27, %v1238_v45 }
 0x133   :  { %v428_v30 = vmax.f32 %v307_v29, 0.0 }
 0x135   :  { %v436_v31 = vmin.f32 %v428_v30, 9e+13  ;;  %v238_v30 = vmax.f32 %v133_v28, 0.0 }
 0x137   :  { %v1228_v33 = vsel %vm460_vm8, %v436_v31, -9e+15  ;;  %657 = vmatpush.msrb.mxu3 %v238_v30 }
 0x138   :  { %v481_v35 = vsel %vm474_vm4, %v1228_v33, -inf }
 0x139   :  { %482 = vmax.xlane.f32.xlu1 %v481_v35  ;;  %v135_v36 = vpop.f32.mrf.mxu0 }
 0x13a   :  { %v327_v37 = vpop.f32.mrf.mxu3 }
 0x13b   :  { %v429_v38 = vmax.f32 %v327_v37, 0.0 }
 0x13d   :  { %v437_v39 = vmin.f32 %v429_v38, 9e+13 }
 0x13f   :  { %v1233_v41 = vsel %vm461_vm10, %v437_v39, -9e+15 }
 0x140   :  { %v484_v43 = vsel %vm474_vm4, %v1233_v41, -inf }
 0x141   :  { %485 = vmax.xlane.f32.xlu0 %v484_v43  ;;  %v138_v43 = vpop.f32.mrf.mxu0 }
 0x142   :  { %v347_v47 = vpop.f32.mrf.mxu3  ;;  %v139_v44 = vadd.f32 %v138_v43, %v1238_v45 }
 0x143   :  { %v430_v48 = vmax.f32 %v347_v47, 0.0 }
 0x144   :  { %v244_v47 = vmax.f32 %v139_v44, 0.0 }
 0x145   :  { %v438_v50 = vmin.f32 %v430_v48, 9e+13 }
 0x146   :  { %703 = vmatpush.msra.mxu1 %v244_v47 }
 0x147   :  { %v1242_v53 = vsel %vm462_vm12, %v438_v50, -9e+15 }
 0x148   :  { %v487_v55 = vsel %vm474_vm4, %v1242_v53, -inf }
 0x149   :  { %488 = vmax.xlane.f32.xlu2 %v487_v55  ;;  %v141_v51 = vpop.f32.mrf.mxu0 }
 0x14a   :  { %v367_v57 = vpop.f32.mrf.mxu3  ;;  %v142_v52 = vadd.f32 %v141_v51, %v1238_v45 }
 0x14b   :  { %v431_v59 = vmax.f32 %v367_v57, 0.0 }
 0x14c   :  { %v247_v55 = vmax.f32 %v142_v52, 0.0 }
 0x14d   :  { %v439_v61 = vmin.f32 %v431_v59, 9e+13 }
 0x14e   :  { %726 = vmatpush.msra.mxu2 %v247_v55 }
 0x14f   :  { %v1248_v63 = vsel %vm463_vm14, %v439_v61, -9e+15 }
 0x150   :  { %v490_v1 = vsel %vm474_vm4, %v1248_v63, -inf }
 0x151   :  { %491 = vmax.xlane.f32.xlu0 %v490_v1 }
 0x152   :  { %v387_v4 = vpop.f32.mrf.mxu3 }
 0x153   :  { %v432_v6 = vmax.f32 %v387_v4, 0.0 }
 0x155   :  { %v440_v9 = vmin.f32 %v432_v6, 9e+13 }
 0x157   :  { %v1254_v17 = vsel %vm464_vm1, %v440_v9, -9e+15 }
 0x158   :  { %v493_v11 = vsel %vm474_vm4, %v1254_v17, -inf }
 0x159   :  { %494 = vmax.xlane.f32.xlu1 %v493_v11 }
 0x15a   :  { %v407_v13 = vpop.f32.mrf.mxu3 }
 0x15b   :  { %v433_v15 = vmax.f32 %v407_v13, 0.0 }
 0x15d   :  { %v441_v21 = vmin.f32 %v433_v15, 9e+13 }
 0x15f   :  { %v1259_v22 = vsel %vm465_vm2, %v441_v21, -9e+15 }
 0x160   :  { %v496_v8 = vsel %vm474_vm4, %v1259_v22, -inf }
 0x161   :  { %497 = vmax.xlane.f32.xlu2 %v496_v8 }
 0x19c   :  { %v477_v23 = vpop.xlane.xlu0 %476 }
 0x19d   :  { %v499_v24 = vsub.f32 %v1218_v19, %v477_v23  ;;  %v136_v19 = vadd.f32 %v135_v36, %v1238_v45 }
 0x19f   :  { %v507_v26 = vmul.f32 1.442695, %v499_v24  ;;  %v241_v38 = vmax.f32 %v136_v19, 0.0 }
 0x1a1   :  { %919 = vpow2.f32 %v507_v26  ;;  %680 = vmatpush.msra.mxu0 %v241_v38 }
 0x1a4   :  { %v480_v29 = vpop.xlane.xlu1 %479 }
 0x1a5   :  { %v500_v31 = vsub.f32 %v1223_v25, %v480_v29 }
 0x1a7   :  { %v920_v32 = vpop.eup %919  ;;  %v509_v34 = vmul.f32 1.442695, %v500_v31 }
 0x1a8   :  { %903 = vmatmul.msk.f32.vlgmr.msra.gmra.mxu3 %vm474_vm4, %v920_v32  ;;  %v523_v35 = vsel %vm474_vm4, %v920_v32, 0.0 }
 0x1a9   :  { %921 = vpow2.f32 %v509_v34  ;;  %524 = vadd.xlane.f32.xlu2 %v523_v35 }
 0x1ac   :  { %v483_v37 = vpop.xlane.xlu1 %482 }
 0x1ad   :  { %v501_v39 = vsub.f32 %v1228_v33, %v483_v37 }
 0x1af   :  { %v922_v40 = vpop.eup %921  ;;  %v511_v42 = vmul.f32 1.442695, %v501_v39 }
 0x1b0   :  { %904 = vmatmul.msk.f32.vlgmr.msrb.gmra.mxu0 %vm474_vm4, %v922_v40  ;;  %v526_v25 = vsel %vm474_vm4, %v922_v40, 0.0 }
 0x1b1   :  { %923 = vpow2.f32 %v511_v42  ;;  %527 = vadd.xlane.f32.xlu0 %v526_v25 }
 0x1b4   :  { %v486_v46 = vpop.xlane.xlu0 %485 }
 0x1b5   :  { %v502_v48 = vsub.f32 %v1233_v41, %v486_v46 }
 0x1b7   :  { %v924_v49 = vpop.eup %923  ;;  %v513_v50 = vmul.f32 1.442695, %v502_v48 }
 0x1b8   :  { %905 = vmatmul.msk.f32.vlgmr.msrb.gmra.mxu1 %vm474_vm4, %v924_v49  ;;  %v529_v33 = vsel %vm474_vm4, %v924_v49, 0.0 }
 0x1b9   :  { %925 = vpow2.f32 %v513_v50  ;;  %530 = vadd.xlane.f32.xlu1 %v529_v33 }
 0x1bc   :  { %v489_v54 = vpop.xlane.xlu2 %488 }
 0x1bd   :  { %v503_v16 = vsub.f32 %v1242_v53, %v489_v54 }
 0x1bf   :  { %v926_v56 = vpop.eup %925  ;;  %v515_v57 = vmul.f32 1.442695, %v503_v16 }
 0x1c0   :  { %906 = vmatmul.msk.f32.vlgmr.msrb.gmra.mxu2 %vm474_vm4, %v926_v56  ;;  %v532_v41 = vsel %vm474_vm4, %v926_v56, 0.0 }
 0x1c1   :  { %927 = vpow2.f32 %v515_v57  ;;  %533 = vadd.xlane.f32.xlu2 %v532_v41 }
 0x1c4   :  { %v492_v58 = vpop.xlane.xlu0 %491 }
 0x1c5   :  { %v504_v59 = vsub.f32 %v1248_v63, %v492_v58 }
 0x1c7   :  { %v928_v60 = vpop.eup %927  ;;  %v517_v61 = vmul.f32 1.442695, %v504_v59 }
 0x1c8   :  { %907 = vmatmul.msk.f32.vlgmr.msrb.gmra.mxu3 %vm474_vm4, %v928_v60  ;;  %v535_v45 = vsel %vm474_vm4, %v928_v60, 0.0 }
 0x1c9   :  { %929 = vpow2.f32 %v517_v61  ;;  %536 = vadd.xlane.f32.xlu0 %v535_v45 }
 0x1cc   :  { %v495_v53 = vpop.xlane.xlu1 %494 }
 0x1cd   :  { %v505_v62 = vsub.f32 %v1254_v17, %v495_v53 }
 0x1cf   :  { %v930_v0 = vpop.eup %929  ;;  %v519_v1 = vmul.f32 1.442695, %v505_v62 }
 0x1d0   :  { %908 = vmatmul.msk.f32.vlgmr.msra.gmra.mxu0 %vm474_vm4, %v930_v0  ;;  %v538_v2 = vsel %vm474_vm4, %v930_v0, 0.0 }
 0x1d1   :  { %931 = vpow2.f32 %v519_v1  ;;  %539 = vadd.xlane.f32.xlu1 %v538_v2 }
 0x1d4   :  { %v498_v63 = vpop.xlane.xlu2 %497 }
 0x1d5   :  { %v506_v3 = vsub.f32 %v1259_v22, %v498_v63 }
 0x1d7   :  { %v932_v4 = vpop.eup %931  ;;  %v521_v5 = vmul.f32 1.442695, %v506_v3 }
 0x1d8   :  { %909 = vmatmul.msk.f32.vlgmr.msra.gmra.mxu1 %vm474_vm4, %v932_v4  ;;  %v541_v6 = vsel %vm474_vm4, %v932_v4, 0.0 }
 0x1d9   :  { %933 = vpow2.f32 %v521_v5  ;;  %542 = vadd.xlane.f32.xlu2 %v541_v6 }
 0x1df   :  { %v934_v7 = vpop.eup %933 }
 0x1e0   :  { %910 = vmatmul.msk.f32.vlgmr.msra.gmra.mxu2 %vm474_vm4, %v934_v7  ;;  %v544_v9 = vsel %vm474_vm4, %v934_v7, 0.0 }
 0x1e1   :  { %545 = vadd.xlane.f32.xlu0 %v544_v9 }
 0x21c   :  { %v525_v10 = vpop.xlane.xlu2 %524 }
 0x21d   :  { %935 = vrcp.f32 %v525_v10  ;;  %v742_v13 = vand.u32 2147483648, %v525_v10  ;;  %v740_v15 = vand.u32 2147483647, %v525_v10  ;;  %vm736_vm5 = vweird.f32 %v525_v10 }
 0x21f   :  { %v743_v22 = vor.u32 1.1754944e-38, %v742_v13  ;;  %vm741_vm4 = vcmp.eq.f32.partialorder %v740_v15, 8.507059e+37 }
 0x223   :  { %v936_v17 = vpop.eup %935 }
 0x224   :  { %v732_v11 = vmul.f32 %v936_v17, %v525_v10  ;;  %v528_v18 = vpop.xlane.xlu0 %527  ;;  %vm737_vm3 = vweird.f32 %v936_v17 }
 0x225   :  { %937 = vrcp.f32 %v528_v18  ;;  %vm738_vm6 = vmor %vm736_vm5, %vm737_vm3  ;;  %v756_v30 = vand.u32 2147483648, %v528_v18  ;;  %v754_v32 = vand.u32 2147483647, %v528_v18  ;;  %vm750_vm8 = vweird.f32 %v528_v18 }
 0x226   :  { %v733_v12 = vsub.f32 1.0, %v732_v11 }
 0x227   :  { %v757_v36 = vor.u32 1.1754944e-38, %v756_v30  ;;  %vm755_vm10 = vcmp.eq.f32.partialorder %v754_v32, 8.507059e+37 }
 0x228   :  { %v734_v14 = vmul.f32 %v936_v17, %v733_v12 }
 0x22a   :  { %v735_v20 = vadd.f32 %v936_v17, %v734_v14 }
 0x22b   :  { %v938_v21 = vpop.eup %937  ;;  %v567_v26 = vpop.f32.mrf.mxu3 }
 0x22c   :  { %v746_v8 = vmul.f32 %v938_v21, %v528_v18  ;;  %v739_v23 = vsel %vm738_vm6, %v936_v17, %v735_v20  ;;  %v531_v24 = vpop.xlane.xlu1 %530  ;;  %vm751_vm7 = vweird.f32 %v938_v21 }
 0x22d   :  { %v744_v27 = vsel %vm741_vm4, %v743_v22, %v739_v23  ;;  %939 = vrcp.f32 %v531_v24  ;;  %vm752_vm9 = vmor %vm750_vm8, %vm751_vm7  ;;  %v590_v39 = vpop.f32.mrf.mxu0  ;;  %v770_v43 = vand.u32 2147483648, %v531_v24  ;;  %v768_v46 = vand.u32 2147483647, %v531_v24 }
 0x22e   :  { %v747_v28 = vsub.f32 1.0, %v746_v8  ;;  %v843_v29 = vmul.f32 %v744_v27, %v567_v26  ;;  %vm764_vm12 = vweird.f32 %v531_v24 }
 0x22f   :  { %v771_v49 = vor.u32 1.1754944e-38, %v770_v43  ;;  %vm769_vm14 = vcmp.eq.f32.partialorder %v768_v46, 8.507059e+37 }
 0x230   :  { %851 = vst.msk [vmem:[#allocation7] sm:$0xff] %vm78_vm0, %v843_v29  ;;  %v748_v31 = vmul.f32 %v938_v21, %v747_v28 }
 0x232   :  { %v749_v34 = vadd.f32 %v938_v21, %v748_v31 }
 0x233   :  { %v940_v35 = vpop.eup %939 }
 0x234   :  { %v760_v19 = vmul.f32 %v940_v35, %v531_v24  ;;  %v753_v37 = vsel %vm752_vm9, %v938_v21, %v749_v34  ;;  %v534_v38 = vpop.xlane.xlu2 %533  ;;  %vm765_vm11 = vweird.f32 %v940_v35 }
 0x235   :  { %v758_v40 = vsel %vm755_vm10, %v757_v36, %v753_v37  ;;  %941 = vrcp.f32 %v534_v38  ;;  %vm766_vm13 = vmor %vm764_vm12, %vm765_vm11  ;;  %v613_v52 = vpop.f32.mrf.mxu1  ;;  %v784_v56 = vand.u32 2147483648, %v534_v38  ;;  %v782_v41 = vand.u32 2147483647, %v534_v38 }
 0x236   :  { %v761_v42 = vsub.f32 1.0, %v760_v19  ;;  %v844_v25 = vmul.f32 %v758_v40, %v590_v39  ;;  %vm778_vm1 = vweird.f32 %v534_v38 }
 0x237   :  { %v785_v60 = vor.u32 1.1754944e-38, %v784_v56  ;;  %vm783_vm3 = vcmp.eq.f32.partialorder %v782_v41, 8.507059e+37 }
 0x238   :  { %852 = vst.msk [vmem:[#allocation7 + $0x8] sm:$0xff] %vm78_vm0, %v844_v25  ;;  %v762_v44 = vmul.f32 %v940_v35, %v761_v42 }
 0x23a   :  { %v763_v47 = vadd.f32 %v940_v35, %v762_v44 }
 0x23b   :  { %v942_v48 = vpop.eup %941 }
 0x23c   :  { %v774_v50 = vmul.f32 %v942_v48, %v534_v38  ;;  %v767_v33 = vsel %vm766_vm13, %v940_v35, %v763_v47  ;;  %v537_v51 = vpop.xlane.xlu0 %536  ;;  %vm779_vm15 = vweird.f32 %v942_v48 }
 0x23d   :  { %v772_v54 = vsel %vm769_vm14, %v771_v49, %v767_v33  ;;  %943 = vrcp.f32 %v537_v51  ;;  %vm780_vm2 = vmor %vm778_vm1, %vm779_vm15  ;;  %v798_v63 = vand.u32 2147483648, %v537_v51  ;;  %v796_v4 = vand.u32 2147483647, %v537_v51 }
 0x23e   :  { %v775_v55 = vsub.f32 1.0, %v774_v50  ;;  %v845_v16 = vmul.f32 %v772_v54, %v613_v52  ;;  %vm792_vm6 = vweird.f32 %v537_v51 }
 0x23f   :  { %v799_v7 = vor.u32 1.1754944e-38, %v798_v63  ;;  %vm797_vm7 = vcmp.eq.f32.partialorder %v796_v4, 8.507059e+37 }
 0x240   :  { %853 = vst.msk [vmem:[#allocation7 + $0x10] sm:$0xff] %vm78_vm0, %v845_v16  ;;  %v776_v57 = vmul.f32 %v942_v48, %v775_v55 }
 0x242   :  { %v777_v58 = vadd.f32 %v942_v48, %v776_v57 }
 0x243   :  { %v944_v59 = vpop.eup %943  ;;  %v636_v62 = vpop.f32.mrf.mxu2 }
 0x244   :  { %v788_v61 = vmul.f32 %v944_v59, %v537_v51  ;;  %v781_v45 = vsel %vm780_vm2, %v942_v48, %v777_v58  ;;  %v540_v53 = vpop.xlane.xlu1 %539  ;;  %vm793_vm5 = vweird.f32 %v944_v59 }
 0x245   :  { %v786_v0 = vsel %vm783_vm3, %v785_v60, %v781_v45  ;;  %945 = vrcp.f32 %v540_v53  ;;  %vm794_vm4 = vmor %vm792_vm6, %vm793_vm5  ;;  %v812_v14 = vand.u32 2147483648, %v540_v53  ;;  %v810_v20 = vand.u32 2147483647, %v540_v53 }
 0x246   :  { %v789_v1 = vsub.f32 1.0, %v788_v61  ;;  %v846_v2 = vmul.f32 %v786_v0, %v636_v62  ;;  %vm806_vm9 = vweird.f32 %v540_v53 }
 0x247   :  { %v813_v8 = vor.u32 1.1754944e-38, %v812_v14  ;;  %vm811_vm11 = vcmp.eq.f32.partialorder %v810_v20, 8.507059e+37 }
 0x248   :  { %854 = vst.msk [vmem:[#allocation7 + $0x18] sm:$0xff] %vm78_vm0, %v846_v2  ;;  %v790_v3 = vmul.f32 %v944_v59, %v789_v1 }
 0x24a   :  { %v791_v5 = vadd.f32 %v944_v59, %v790_v3 }
 0x24b   :  { %v946_v6 = vpop.eup %945  ;;  %v659_v11 = vpop.f32.mrf.mxu3 }
 0x24c   :  { %v802_v9 = vmul.f32 %v946_v6, %v540_v53  ;;  %v795_v10 = vsel %vm794_vm4, %v944_v59, %v791_v5  ;;  %v543_v17 = vpop.xlane.xlu2 %542  ;;  %vm807_vm8 = vweird.f32 %v946_v6 }
 0x24d   :  { %v800_v18 = vsel %vm797_vm7, %v799_v7, %v795_v10  ;;  %947 = vrcp.f32 %v543_v17  ;;  %vm808_vm10 = vmor %vm806_vm9, %vm807_vm8  ;;  %v682_v27 = vpop.f32.mrf.mxu0  ;;  %v826_v31 = vand.u32 2147483648, %v543_v17  ;;  %v824_v34 = vand.u32 2147483647, %v543_v17 }
 0x24e   :  { %v803_v12 = vsub.f32 1.0, %v802_v9  ;;  %v847_v13 = vmul.f32 %v800_v18, %v659_v11  ;;  %vm820_vm13 = vweird.f32 %v543_v17 }
 0x24f   :  { %v827_v19 = vor.u32 1.1754944e-38, %v826_v31  ;;  %vm825_vm15 = vcmp.eq.f32.partialorder %v824_v34, 8.507059e+37 }
 0x250   :  { %v804_v15 = vmul.f32 %v946_v6, %v803_v12  ;;  %855 = vst.msk [vmem:[#allocation7 + $0x20] sm:$0xff] %vm78_vm0, %v847_v13 }
 0x252   :  { %v805_v21 = vadd.f32 %v946_v6, %v804_v15 }
 0x253   :  { %v948_v22 = vpop.eup %947 }
 0x254   :  { %v816_v23 = vmul.f32 %v948_v22, %v543_v17  ;;  %v809_v24 = vsel %vm808_vm10, %v946_v6, %v805_v21  ;;  %v546_v26 = vpop.xlane.xlu0 %545  ;;  %vm821_vm12 = vweird.f32 %v948_v22 }
 0x255   :  { %v814_v28 = vsel %vm811_vm11, %v813_v8, %v809_v24  ;;  %949 = vrcp.f32 %v546_v26  ;;  %vm822_vm14 = vmor %vm820_vm13, %vm821_vm12  ;;  %v705_v39 = vpop.f32.mrf.mxu1  ;;  %v840_v43 = vand.u32 2147483648, %v546_v26  ;;  %v838_v46 = vand.u32 2147483647, %v546_v26 }
 0x256   :  { %v817_v29 = vsub.f32 1.0, %v816_v23  ;;  %v848_v30 = vmul.f32 %v814_v28, %v682_v27  ;;  %vm834_vm2 = vweird.f32 %v546_v26 }
 0x257   :  { %v841_v48 = vor.u32 1.1754944e-38, %v840_v43  ;;  %vm839_vm5 = vcmp.eq.f32.partialorder %v838_v46, 8.507059e+37 }
 0x258   :  { %v818_v32 = vmul.f32 %v948_v22, %v817_v29  ;;  %856 = vst.msk [vmem:[#allocation7 + $0x28] sm:$0xff] %vm78_vm0, %v848_v30 }
 0x25a   :  { %v819_v35 = vadd.f32 %v948_v22, %v818_v32 }
 0x25b   :  { %v950_v36 = vpop.eup %949 }
 0x25c   :  { %v830_v37 = vmul.f32 %v950_v36, %v546_v26  ;;  %v823_v38 = vsel %vm822_vm14, %v948_v22, %v819_v35  ;;  %vm835_vm1 = vweird.f32 %v950_v36 }
 0x25d   :  { %v828_v40 = vsel %vm825_vm15, %v827_v19, %v823_v38  ;;  %vm836_vm3 = vmor %vm834_vm2, %vm835_vm1 }
 0x25e   :  { %v831_v42 = vsub.f32 1.0, %v830_v37  ;;  %v849_v25 = vmul.f32 %v828_v40, %v705_v39 }
 0x260   :  { %v832_v44 = vmul.f32 %v950_v36, %v831_v42  ;;  %857 = vst.msk [vmem:[#allocation7 + $0x30] sm:$0xff] %vm78_vm0, %v849_v25 }
 0x262   :  { %v833_v47 = vadd.f32 %v950_v36, %v832_v44 }
 0x263   :  { %v728_v50 = vpop.f32.mrf.mxu2 }
 0x264   :  { %v837_v49 = vsel %vm836_vm3, %v950_v36, %v833_v47 }
 0x265   :  { %v842_v33 = vsel %vm839_vm5, %v841_v48, %v837_v49 }
 0x266   :  { %v850_v51 = vmul.f32 %v842_v33, %v728_v50 }
 0x268   :  { %858 = vst.msk [vmem:[#allocation7 + $0x38] sm:$0xff] %vm78_vm0, %v850_v51 }
 0x269   :  { %871 = dma.vmem_to_hbm [thread:$0]  %s864_s10, 1024, %s866_s13, [#allocation4], %s1035_s14, %s1035_s14, %s1036_s15  }
 0x26a   :  { %1027 = dma.done.wait [#allocation4], 1024  }
 0x26b   :  { %1028 = vsyncadd [#allocation4], 4294966272 }
 0x26c   :  { %876 = vsyncpa [#allocation3], 1 }
 0x26d   :  { %877 = vsyncpa [#allocation6], 1 }
 0x26e   :  { %878 = vsyncpa [#allocation4], 1 }

</bundles_post_ra>
